<compile_context>
chip_gen: v6e
topology: v6e:2x2x1
jax: 0.10.0
libtpu: 0.0.40
codegen_flags: <defaults>
</compile_context>

<pallas_src>
import jax
import jax.numpy as jnp
from jax.experimental import pallas as pl
from jax.experimental.pallas import tpu as pltpu


_TARGET_TILE_BYTES = 2 * 1024 * 1024     # ~2 MiB per tile; x4 with in+out double buffers
_VMEM_LIMIT_BYTES = 32 * 1024 * 1024     # explicit cap: below v7x physical (64 MiB)


def _identity_kernel(x_ref, o_ref):
    # Pure copy of the current tile (identity hot path).
    o_ref[...] = x_ref[...]


def _tiled_copy(x2d: jax.Array, block_rows: int) -> jax.Array:
    rows, lane = x2d.shape
    grid = (pl.cdiv(rows, block_rows),)
    return pl.pallas_call(
        _identity_kernel,
        out_shape=jax.ShapeDtypeStruct((rows, lane), x2d.dtype),
        grid_spec=pltpu.PrefetchScalarGridSpec(
            num_scalar_prefetch=0,
            grid=grid,
            in_specs=[pl.BlockSpec((block_rows, lane), lambda i: (i, 0))],
            out_specs=pl.BlockSpec((block_rows, lane), lambda i: (i, 0)),
        ),
        # Biggest lever for a pure copy: alias output buffer to input buffer.
        input_output_aliases={0: 0},
        compiler_params=pltpu.CompilerParams(
            dimension_semantics=("parallel",),
            vmem_limit_bytes=_VMEM_LIMIT_BYTES,
        ),
    )(x2d)


@jax.jit
def identity(x: jax.Array) -> jax.Array:
    """Pallas implementation of Identity.forward: returns x unchanged."""
    orig_shape = x.shape
    n = x.size
    if n == 0:
        return x

    itemsize = jnp.dtype(x.dtype).itemsize
    # Sublane packing multiple: (8,128) f32, (16,128) bf16, (32,128) int8/fp8.
    sublane_mult = max(8, 32 // itemsize)
    lane = 128

    if n % (sublane_mult * lane) == 0:
        # Aligned fast path: view-only reshape, no pad / post-slice.
        rows = n // lane
        x2d = x.reshape(rows, lane)
        max_rows = max(
            sublane_mult,
            (_TARGET_TILE_BYTES // (lane * itemsize)) // sublane_mult * sublane_mult,
        )
        block_rows = min(rows, max_rows)  # both multiples of sublane_mult
        out2d = _tiled_copy(x2d, block_rows)
        return out2d.reshape(orig_shape)

    # Fallback for element counts that aren't (sublane*128)-aligned:
    # flatten to 2D keeping the original last dim. Block dims either equal the
    # full array dims or are sublane-aligned, so no padding copy is required.
    d1 = orig_shape[-1] if x.ndim >= 2 else n
    d0 = n // d1
    x2d = x.reshape(d0, d1)
    row_bytes = max(1, d1 * itemsize)
    max_rows = max(1, _TARGET_TILE_BYTES // row_bytes)
    if d0 <= max_rows:
        block_rows = d0  # block equals full dims -> always legal
    else:
        block_rows = min(d0, max(sublane_mult, (max_rows // sublane_mult) * sublane_mult))
    out2d = _tiled_copy(x2d, block_rows)
    return out2d.reshape(orig_shape)


if __name__ == "__main__":
    key = jax.random.PRNGKey(0)

    # Identity(channel=4) applied to an NCHW tensor (aligned fast path).
    x = jax.random.normal(key, (2, 4, 16, 16), dtype=jnp.float32)
    y = jax.block_until_ready(identity(x))
    assert y.shape == x.shape and y.dtype == x.dtype
    assert bool(jnp.all(y == x))

    # Packed dtype (bf16) still hits the aligned path with a 16-row sublane tile.
    xb = x.astype(jnp.bfloat16)
    yb = jax.block_until_ready(identity(xb))
    assert yb.shape == xb.shape and yb.dtype == xb.dtype
    assert bool(jnp.all(yb == xb))

    # Odd, non-128-aligned shape exercises the full-dim-block fallback (no pad).
    xo = jax.random.normal(key, (3, 5, 7), dtype=jnp.float32)
    yo = jax.block_until_ready(identity(xo))
    assert yo.shape == xo.shape and yo.dtype == xo.dtype
    assert bool(jnp.all(yo == xo))

    print("KERNEL_OK")
</pallas_src>

<mosaic_0001>
module attributes {stable_mosaic.version = 11 : i64} {
  func.func @_identity_kernel(%arg0: i32, %arg1: memref<16x128xf32, #tpu.memory_space<vmem>>, %arg2: memref<16x128xf32, #tpu.memory_space<vmem>>) attributes {dimension_semantics = [#tpu.dimension_semantics<parallel>], iteration_bounds = array<i64: 1>, scalar_prefetch = 0 : i64, scratch_operands = 0 : i64, tpu.core_type = #tpu.core_type<tc>, window_params = [{transform_indices = @transform_0, window_bounds = array<i64: 16, 128>}, {transform_indices = @transform_1, window_bounds = array<i64: 16, 128>}]} {
    %c0 = arith.constant 0 : index
    %c0_0 = arith.constant 0 : index
    %0 = vector.load %arg1[%c0, %c0_0] : memref<16x128xf32, #tpu.memory_space<vmem>>, vector<16x128xf32>
    %c0_1 = arith.constant 0 : index
    %c0_2 = arith.constant 0 : index
    %1 = vector.load %arg2[%c0_1, %c0_2] : memref<16x128xf32, #tpu.memory_space<vmem>>, vector<16x128xf32>
    tpu.vector_store %arg2[%c0_1, %c0_2], %0 {strides = array<i32>} : memref<16x128xf32, #tpu.memory_space<vmem>>, vector<16x128xf32>,
    return
  }
  func.func @transform_0(%arg0: i32) -> (i32, i32) {
    %c0_i32 = arith.constant 0 : i32
    %c0_i32_0 = arith.constant 0 : i32
    return %arg0, %c0_i32 : i32, i32
  }
  func.func @transform_1(%arg0: i32) -> (i32, i32) {
    %c0_i32 = arith.constant 0 : i32
    %c0_i32_0 = arith.constant 0 : i32
    return %arg0, %c0_i32 : i32, i32
  }
}

</mosaic_0001>

<bundles_post_ra>
// kernel: identity.1
= control target key start
LH: loop header
LB: loop body
LE: loop exit
PB: predicated region body
PF: predicated region fallthrough
CT: control target
= control target key end

     0   :  { %s38_s0 = inlined_call_operand.vmem [shape: f32[16,128], index: 0, kind: input, shape index: {}, may-alias: {0,1}]   ;;  %s39_s1 = inlined_call_operand.vmem [shape: f32[16,128], index: 1, kind: output, shape index: {}, may-alias: {0,1}]  }
   0x1   :  { %v8_v0 = vld [vmem:[%s38_s0] sm:$0xff]  ;;  %v9_v1 = vld [vmem:[%s38_s0 + $0x8] sm:$0xff] }
   0x2   :  { %10 = vst [vmem:[%s39_s1] sm:$0xff] %v8_v0  ;;  %11 = vst [vmem:[%s39_s1 + $0x8] sm:$0xff] %v9_v1 }

</bundles_post_ra>
